<compile_context>
chip_gen: v7x
topology: tpu7x:2x2x1
jax: 0.10.0
libtpu: 0.0.40
codegen_flags: <defaults>
</compile_context>

<pallas_src>
import functools

import jax
import jax.numpy as jnp
from jax import lax
from jax.experimental import pallas as pl
from jax.experimental.pallas import tpu as pltpu

LANE = 128


def _round_up(x, m):
    return (x + m - 1) // m * m


def _default_grid_min_steps():
    # v7x has 2 TensorCores per chip; give the "parallel" grid axis >= 2 steps
    # so both cores get work.  v5e/v6e have 1 TC -> prefer grid = 1.
    try:
        kind = jax.devices()[0].device_kind.lower()
    except Exception:
        return 1
    return 2 if "v7" in kind else 1


# ----------------------------- Pallas kernel ------------------------------ #
def mlp_kernel(ids_ref, g1_ref, b1_ref, w2_ref, b2_ref, w3_ref, b3_ref,
               o_ref, *, vocab_num):
    """Fused: embedding gather folded into layer 1 (one-hot @ G1) -> ReLU ->
    Linear -> ReLU -> Linear (lane-dense padded classifier)."""
    tile_b, W = ids_ref.shape
    WV = g1_ref.shape[0]            # W * V
    V = vocab_num

    ids = ids_ref[...]              # (tile_b, W) int32 token ids for this tile

    # Flat one-hot code per (row, word): k = w*V + ids[b, w].
    offs = lax.broadcasted_iota(jnp.int32, (tile_b, W), 1) * V
    code = ids + offs                                              # (tile_b, W)
    iota_k = lax.broadcasted_iota(jnp.int32, (tile_b, WV), 1)      # (tile_b, W*V)

    # OR the per-word boolean compares (codes are disjoint across words),
    # single cast to bf16 at the end -> minimal VALU work, MXU-ready operand.
    m = code[:, 0:1] == iota_k
    for w in range(1, W):           # static, unrolled (W is small)
        m = m | (code[:, w:w + 1] == iota_k)
    onehot = m.astype(jnp.bfloat16)                                # (tile_b, W*V)

    # gather + flatten + Linear1 fused:  onehot @ (blockdiag(table) @ W1)
    h1 = jnp.dot(onehot, g1_ref[...],
                 preferred_element_type=jnp.float32) + b1_ref[...]
    h1 = jnp.maximum(h1, 0.0)
    h2 = jnp.dot(h1.astype(jnp.bfloat16), w2_ref[...],
                 preferred_element_type=jnp.float32) + b2_ref[...]
    h2 = jnp.maximum(h2, 0.0)
    out = jnp.dot(h2.astype(jnp.bfloat16), w3_ref[...],
                  preferred_element_type=jnp.float32) + b3_ref[...]
    o_ref[...] = out.astype(o_ref.dtype)


# ------------------------------- wrapper ----------------------------------- #
def mlp_forward(vocab_id, table, w1, b1, w2, b2, w3, b3, *,
                max_norm=1.0, eps=1e-7, tile_b=2048, min_steps=None,
                kernel_out_dtype=jnp.bfloat16):
    """vocab_id: (B, W) int32; table: (V, E); w_i in (fan_in, fan_out) layout.

    Returns f32 logits of shape (B, num_classes).
    """
    B, W = vocab_id.shape
    V, E = table.shape
    H1 = w1.shape[1]
    H2 = w2.shape[1]
    C = w3.shape[1]

    # --- tiny parameter-side prep (O(V*E*H1), independent of batch) -------- #
    # nn.Embedding(max_norm=1): rows with L2 norm > max_norm are rescaled.
    norms = jnp.linalg.norm(table, axis=1, keepdims=True)
    scale = jnp.where(norms > max_norm, max_norm / (norms + eps), 1.0)
    tbl = table * scale                                            # f32 (V, E)

    # Fold the block-diag gather matrix into W1 (exact, since each block-diag
    # row has exactly one live E-wide segment):
    #   G1[w*V + v, :] = tbl[v, :] @ w1[w*E:(w+1)*E, :]
    w1_r = w1.astype(jnp.float32).reshape(W, E, H1)
    g1 = jnp.einsum("ve,weh->wvh", tbl.astype(jnp.float32), w1_r,
                    preferred_element_type=jnp.float32)
    g1 = g1.reshape(W * V, H1).astype(jnp.bfloat16)                # (W*V, H1)

    # lane-dense output: pad classifier columns C -> multiple of 128
    Cp = _round_up(max(C, LANE), LANE)
    w3p = jnp.zeros((H2, Cp), jnp.bfloat16).at[:, :C].set(w3.astype(jnp.bfloat16))
    b3p = jnp.zeros((1, Cp), jnp.float32).at[:, :C].set(
        b3.reshape(1, C).astype(jnp.float32))

    w2b = w2.astype(jnp.bfloat16)
    b1r = b1.reshape(1, H1).astype(jnp.float32)
    b2r = b2.reshape(1, H2).astype(jnp.float32)

    # --- batch tiling: derive tile from batch (balanced, no tile-1 waste) -- #
    if min_steps is None:
        min_steps = _default_grid_min_steps()
    sub = 16 if jnp.dtype(kernel_out_dtype).itemsize == 2 else 8
    n_steps = max(min_steps, pl.cdiv(B, tile_b))
    tile = _round_up(max(pl.cdiv(B, n_steps), sub), sub)
    Bp = n_steps * tile

    # TODO(synk): torch.nn.Embedding raises on out-of-range ids; here an
    # out-of-range / negative id yields an all-zero one-hot row (zero
    # embedding) instead of failing.
    ids = vocab_id.astype(jnp.int32)
    if Bp != B:
        ids = jnp.pad(ids, ((0, Bp - B), (0, 0)))
    grid = (n_steps,)

    out_isize = jnp.dtype(kernel_out_dtype).itemsize
    flops = 2 * Bp * (W * V * H1 + H1 * H2 + H2 * Cp)
    bytes_accessed = (ids.size * 4 + g1.size * 2 + w2b.size * 2 + w3p.size * 2
                      + (b1r.size + b2r.size + b3p.size) * 4
                      + Bp * Cp * out_isize)

    def resident(shape):
        # Constant index_map -> stays VMEM-resident across grid iterations.
        # (pl.Buffered(1) would trim the dead second buffer; left at default
        #  for lowering safety — weights total < 50 KB.)
        return pl.BlockSpec(shape, lambda i: (0, 0))

    out = pl.pallas_call(
        functools.partial(mlp_kernel, vocab_num=V),
        out_shape=jax.ShapeDtypeStruct((Bp, Cp), kernel_out_dtype),
        grid=grid,
        in_specs=[
            pl.BlockSpec((tile, W), lambda i: (i, 0)),   # per-tile token ids
            resident((W * V, H1)),                       # folded gather+W1
            resident((1, H1)),
            resident((H1, H2)), resident((1, H2)),
            resident((H2, Cp)), resident((1, Cp)),
        ],
        out_specs=pl.BlockSpec((tile, Cp), lambda i: (i, 0)),
        compiler_params=pltpu.CompilerParams(
            dimension_semantics=("parallel",)),          # v7x: shard batch over 2 TCs
        cost_estimate=pl.CostEstimate(
            flops=flops, transcendentals=0, bytes_accessed=bytes_accessed),
    )(ids, g1, b1r, w2b, b2r, w3p, b3p)

    return out[:B, :C].astype(jnp.float32)


def mlp_module_forward(params, vocab_id, **kwargs):
    """Full forward matching MLP.forward (eval semantics)."""
    # TODO(synk): Dropout regularizer branch (training-time) omitted — assumes a
    # non-Dropout regularizer / eval semantics.
    return mlp_forward(
        vocab_id, params["embedding"],
        params["w1"], params["b1"],
        params["w2"], params["b2"],
        params["w3"], params["b3"],
        **kwargs,
    )


def init_params(key, vocab_num, embedding_size, word_size, num_classes):
    d_in = embedding_size * word_size
    k = jax.random.split(key, 7)

    def linear_init(kw, kb, fan_in, fan_out):
        # torch.nn.Linear default init: U(-1/sqrt(fan_in), 1/sqrt(fan_in))
        bound = 1.0 / jnp.sqrt(fan_in)
        w = jax.random.uniform(kw, (fan_in, fan_out), jnp.float32, -bound, bound)
        b = jax.random.uniform(kb, (fan_out,), jnp.float32, -bound, bound)
        return w, b

    embedding = jax.random.normal(k[0], (vocab_num, embedding_size), jnp.float32)
    w1, b1 = linear_init(k[1], k[2], d_in, 64)
    w2, b2 = linear_init(k[3], k[4], 64, 32)
    w3, b3 = linear_init(k[5], k[6], 32, num_classes)
    return dict(embedding=embedding, w1=w1, b1=b1, w2=w2, b2=b2, w3=w3, b3=b3)


if __name__ == "__main__":
    vocab_num = 32
    embedding_size = 16
    word_size = 8            # flattened feature dim = 128
    num_classes = 10
    batch = 24
    tile_b = 8               # small tile -> multi-step grid (exercises pipeline)

    key = jax.random.PRNGKey(0)
    kp, kx = jax.random.split(key)
    params = init_params(kp, vocab_num, embedding_size, word_size, num_classes)
    vocab_id = jax.random.randint(kx, (batch, word_size), 0, vocab_num, jnp.int32)

    fwd = jax.jit(functools.partial(mlp_module_forward, tile_b=tile_b))
    out = jax.block_until_ready(fwd(params, vocab_id))
    assert out.shape == (batch, num_classes), out.shape
    assert out.dtype == jnp.float32, out.dtype

    # f32 reference of the same math (kernel uses bf16 MXU operands, f32 accum,
    # bf16 output writeback).
    norms = jnp.linalg.norm(params["embedding"], axis=1, keepdims=True)
    scale = jnp.where(norms > 1.0, 1.0 / (norms + 1e-7), 1.0)
    emb = (params["embedding"] * scale)[vocab_id]                  # (B, W, E)
    x_flat = emb.reshape(batch, -1)
    ref = jnp.maximum(x_flat @ params["w1"] + params["b1"], 0.0)
    ref = jnp.maximum(ref @ params["w2"] + params["b2"], 0.0)
    ref = ref @ params["w3"] + params["b3"]
    max_err = float(jnp.max(jnp.abs(out - ref)))
    assert jnp.allclose(out, ref, atol=3e-2, rtol=3e-2), max_err

    print("KERNEL_OK")
</pallas_src>

<mosaic_0001>
module attributes {stable_mosaic.version = 11 : i64} {
  func.func @mlp_kernel(%arg0: i32, %arg1: memref<16x8xi32, #tpu.memory_space<vmem>>, %arg2: memref<256x64xbf16, #tpu.memory_space<vmem>>, %arg3: memref<1x64xf32, #tpu.memory_space<vmem>>, %arg4: memref<64x32xbf16, #tpu.memory_space<vmem>>, %arg5: memref<1x32xf32, #tpu.memory_space<vmem>>, %arg6: memref<32x128xbf16, #tpu.memory_space<vmem>>, %arg7: memref<1x128xf32, #tpu.memory_space<vmem>>, %arg8: memref<16x128xbf16, #tpu.memory_space<vmem>>) attributes {dimension_semantics = [#tpu.dimension_semantics<parallel>], iteration_bounds = array<i64: 3>, scalar_prefetch = 0 : i64, scratch_operands = 0 : i64, tpu.core_type = #tpu.core_type<tc>, window_params = [{transform_indices = @transform_0, window_bounds = array<i64: 16, 8>}, {pipeline_mode = #tpu.pipeline_mode<synchronous>, transform_indices = @transform_1, window_bounds = array<i64: 256, 64>}, {pipeline_mode = #tpu.pipeline_mode<synchronous>, transform_indices = @transform_2, window_bounds = array<i64: 1, 64>}, {pipeline_mode = #tpu.pipeline_mode<synchronous>, transform_indices = @transform_3, window_bounds = array<i64: 64, 32>}, {pipeline_mode = #tpu.pipeline_mode<synchronous>, transform_indices = @transform_4, window_bounds = array<i64: 1, 32>}, {pipeline_mode = #tpu.pipeline_mode<synchronous>, transform_indices = @transform_5, window_bounds = array<i64: 32, 128>}, {pipeline_mode = #tpu.pipeline_mode<synchronous>, transform_indices = @transform_6, window_bounds = array<i64: 1, 128>}, {transform_indices = @transform_7, window_bounds = array<i64: 16, 128>}]} {
    %c0 = arith.constant 0 : index
    %c0_0 = arith.constant 0 : index
    %0 = vector.load %arg1[%c0, %c0_0] : memref<16x8xi32, #tpu.memory_space<vmem>>, vector<16x8xi32>
    %1 = tpu.iota {dimensions = array<i32: 1>} : vector<16x8xi32>
    %c32_i32 = arith.constant 32 : i32
    %2 = vector.broadcast %c32_i32 : i32 to vector<16x8xi32>
    %3 = arith.muli %1, %2 : vector<16x8xi32>
    %4 = arith.addi %0, %3 : vector<16x8xi32>
    %5 = tpu.iota {dimensions = array<i32: 1>} : vector<16x256xi32>
    %6 = vector.extract_strided_slice %4 {offsets = [0, 0], sizes = [16, 1], strides = [1, 1]} : vector<16x8xi32> to vector<16x1xi32>
    %7 = vector.broadcast %6 : vector<16x1xi32> to vector<16x256xi32>
    %8 = arith.cmpi eq, %7, %5 : vector<16x256xi32>
    %9 = vector.extract_strided_slice %4 {offsets = [0, 1], sizes = [16, 1], strides = [1, 1]} : vector<16x8xi32> to vector<16x1xi32>
    %10 = vector.broadcast %9 : vector<16x1xi32> to vector<16x256xi32>
    %11 = arith.cmpi eq, %10, %5 : vector<16x256xi32>
    %12 = arith.ori %8, %11 : vector<16x256xi1>
    %13 = vector.extract_strided_slice %4 {offsets = [0, 2], sizes = [16, 1], strides = [1, 1]} : vector<16x8xi32> to vector<16x1xi32>
    %14 = vector.broadcast %13 : vector<16x1xi32> to vector<16x256xi32>
    %15 = arith.cmpi eq, %14, %5 : vector<16x256xi32>
    %16 = arith.ori %12, %15 : vector<16x256xi1>
    %17 = vector.extract_strided_slice %4 {offsets = [0, 3], sizes = [16, 1], strides = [1, 1]} : vector<16x8xi32> to vector<16x1xi32>
    %18 = vector.broadcast %17 : vector<16x1xi32> to vector<16x256xi32>
    %19 = arith.cmpi eq, %18, %5 : vector<16x256xi32>
    %20 = arith.ori %16, %19 : vector<16x256xi1>
    %21 = vector.extract_strided_slice %4 {offsets = [0, 4], sizes = [16, 1], strides = [1, 1]} : vector<16x8xi32> to vector<16x1xi32>
    %22 = vector.broadcast %21 : vector<16x1xi32> to vector<16x256xi32>
    %23 = arith.cmpi eq, %22, %5 : vector<16x256xi32>
    %24 = arith.ori %20, %23 : vector<16x256xi1>
    %25 = vector.extract_strided_slice %4 {offsets = [0, 5], sizes = [16, 1], strides = [1, 1]} : vector<16x8xi32> to vector<16x1xi32>
    %26 = vector.broadcast %25 : vector<16x1xi32> to vector<16x256xi32>
    %27 = arith.cmpi eq, %26, %5 : vector<16x256xi32>
    %28 = arith.ori %24, %27 : vector<16x256xi1>
    %29 = vector.extract_strided_slice %4 {offsets = [0, 6], sizes = [16, 1], strides = [1, 1]} : vector<16x8xi32> to vector<16x1xi32>
    %30 = vector.broadcast %29 : vector<16x1xi32> to vector<16x256xi32>
    %31 = arith.cmpi eq, %30, %5 : vector<16x256xi32>
    %32 = arith.ori %28, %31 : vector<16x256xi1>
    %33 = vector.extract_strided_slice %4 {offsets = [0, 7], sizes = [16, 1], strides = [1, 1]} : vector<16x8xi32> to vector<16x1xi32>
    %34 = vector.broadcast %33 : vector<16x1xi32> to vector<16x256xi32>
    %35 = arith.cmpi eq, %34, %5 : vector<16x256xi32>
    %36 = arith.ori %32, %35 : vector<16x256xi1>
    %37 = arith.extui %36 : vector<16x256xi1> to vector<16x256xi32>
    %38 = arith.sitofp %37 : vector<16x256xi32> to vector<16x256xf32>
    %39 = arith.truncf %38 : vector<16x256xf32> to vector<16x256xbf16>
    %c0_1 = arith.constant 0 : index
    %c0_2 = arith.constant 0 : index
    %40 = vector.load %arg2[%c0_1, %c0_2] : memref<256x64xbf16, #tpu.memory_space<vmem>>, vector<256x64xbf16>
    %cst = arith.constant dense<0.000000e+00> : vector<16x64xf32>
    %41 = tpu.matmul %39, %40, %cst {dimension_numbers = #tpu.dot_dimension_numbers<[1], [0], [0], [1], [0, 0, 1, 1], [], []>} : vector<16x256xbf16>, vector<256x64xbf16>, vector<16x64xf32> -> vector<16x64xf32>
    %c0_3 = arith.constant 0 : index
    %c0_4 = arith.constant 0 : index
    %42 = vector.load %arg3[%c0_3, %c0_4] : memref<1x64xf32, #tpu.memory_space<vmem>>, vector<1x64xf32>
    %43 = vector.broadcast %42 : vector<1x64xf32> to vector<16x64xf32>
    %44 = arith.addf %41, %43 : vector<16x64xf32>
    %cst_5 = arith.constant 0.000000e+00 : f32
    %45 = vector.broadcast %cst_5 : f32 to vector<16x64xf32>
    %46 = arith.maximumf %44, %45 : vector<16x64xf32>
    %47 = arith.truncf %46 : vector<16x64xf32> to vector<16x64xbf16>
    %c0_6 = arith.constant 0 : index
    %c0_7 = arith.constant 0 : index
    %48 = vector.load %arg4[%c0_6, %c0_7] : memref<64x32xbf16, #tpu.memory_space<vmem>>, vector<64x32xbf16>
    %cst_8 = arith.constant dense<0.000000e+00> : vector<16x32xf32>
    %49 = tpu.matmul %47, %48, %cst_8 {dimension_numbers = #tpu.dot_dimension_numbers<[1], [0], [0], [1], [0, 0, 1, 1], [], []>} : vector<16x64xbf16>, vector<64x32xbf16>, vector<16x32xf32> -> vector<16x32xf32>
    %c0_9 = arith.constant 0 : index
    %c0_10 = arith.constant 0 : index
    %50 = vector.load %arg5[%c0_9, %c0_10] : memref<1x32xf32, #tpu.memory_space<vmem>>, vector<1x32xf32>
    %51 = vector.broadcast %50 : vector<1x32xf32> to vector<16x32xf32>
    %52 = arith.addf %49, %51 : vector<16x32xf32>
    %cst_11 = arith.constant 0.000000e+00 : f32
    %53 = vector.broadcast %cst_11 : f32 to vector<16x32xf32>
    %54 = arith.maximumf %52, %53 : vector<16x32xf32>
    %55 = arith.truncf %54 : vector<16x32xf32> to vector<16x32xbf16>
    %c0_12 = arith.constant 0 : index
    %c0_13 = arith.constant 0 : index
    %56 = vector.load %arg6[%c0_12, %c0_13] : memref<32x128xbf16, #tpu.memory_space<vmem>>, vector<32x128xbf16>
    %cst_14 = arith.constant dense<0.000000e+00> : vector<16x128xf32>
    %57 = tpu.matmul %55, %56, %cst_14 {dimension_numbers = #tpu.dot_dimension_numbers<[1], [0], [0], [1], [0, 0, 1, 1], [], []>} : vector<16x32xbf16>, vector<32x128xbf16>, vector<16x128xf32> -> vector<16x128xf32>
    %c0_15 = arith.constant 0 : index
    %c0_16 = arith.constant 0 : index
    %58 = vector.load %arg7[%c0_15, %c0_16] : memref<1x128xf32, #tpu.memory_space<vmem>>, vector<1x128xf32>
    %59 = vector.broadcast %58 : vector<1x128xf32> to vector<16x128xf32>
    %60 = arith.addf %57, %59 : vector<16x128xf32>
    %61 = arith.truncf %60 : vector<16x128xf32> to vector<16x128xbf16>
    %c0_17 = arith.constant 0 : index
    %c0_18 = arith.constant 0 : index
    %62 = vector.load %arg8[%c0_17, %c0_18] : memref<16x128xbf16, #tpu.memory_space<vmem>>, vector<16x128xbf16>
    tpu.vector_store %arg8[%c0_17, %c0_18], %61 {strides = array<i32>} : memref<16x128xbf16, #tpu.memory_space<vmem>>, vector<16x128xbf16>,
    return
  }
  func.func @transform_0(%arg0: i32) -> (i32, i32) {
    %c0_i32 = arith.constant 0 : i32
    %c0_i32_0 = arith.constant 0 : i32
    return %arg0, %c0_i32 : i32, i32
  }
  func.func @transform_1(%arg0: i32) -> (i32, i32) {
    %c0_i32 = arith.constant 0 : i32
    %c0_i32_0 = arith.constant 0 : i32
    %c0_i32_1 = arith.constant 0 : i32
    return %c0_i32, %c0_i32_0 : i32, i32
  }
  func.func @transform_2(%arg0: i32) -> (i32, i32) {
    %c0_i32 = arith.constant 0 : i32
    %c0_i32_0 = arith.constant 0 : i32
    %c0_i32_1 = arith.constant 0 : i32
    return %c0_i32, %c0_i32_0 : i32, i32
  }
  func.func @transform_3(%arg0: i32) -> (i32, i32) {
    %c0_i32 = arith.constant 0 : i32
    %c0_i32_0 = arith.constant 0 : i32
    %c0_i32_1 = arith.constant 0 : i32
    return %c0_i32, %c0_i32_0 : i32, i32
  }
  func.func @transform_4(%arg0: i32) -> (i32, i32) {
    %c0_i32 = arith.constant 0 : i32
    %c0_i32_0 = arith.constant 0 : i32
    %c0_i32_1 = arith.constant 0 : i32
    return %c0_i32, %c0_i32_0 : i32, i32
  }
  func.func @transform_5(%arg0: i32) -> (i32, i32) {
    %c0_i32 = arith.constant 0 : i32
    %c0_i32_0 = arith.constant 0 : i32
    %c0_i32_1 = arith.constant 0 : i32
    return %c0_i32, %c0_i32_0 : i32, i32
  }
  func.func @transform_6(%arg0: i32) -> (i32, i32) {
    %c0_i32 = arith.constant 0 : i32
    %c0_i32_0 = arith.constant 0 : i32
    %c0_i32_1 = arith.constant 0 : i32
    return %c0_i32, %c0_i32_0 : i32, i32
  }
  func.func @transform_7(%arg0: i32) -> (i32, i32) {
    %c0_i32 = arith.constant 0 : i32
    %c0_i32_0 = arith.constant 0 : i32
    return %arg0, %c0_i32 : i32, i32
  }
}

</mosaic_0001>

<bundles_post_ra>
// kernel: mlp_module_forward.1
= control target key start
LH: loop header
LB: loop body
LE: loop exit
PB: predicated region body
PF: predicated region fallthrough
CT: control target
= control target key end

     0   :  { %s1021_s24 = smov 0   ;;  %s1199_s0 = inlined_call_operand.vmem [shape: s32[48,8], index: 0, kind: input, shape index: {}]   ;;  %s1200_s1 = inlined_call_operand.vmem [shape: bf16[256,64], index: 1, kind: input, shape index: {}]   ;;  %s1201_s2 = inlined_call_operand.vmem [shape: f32[1,64], index: 2, kind: input, shape index: {}]   ;;  %s1202_s3 = inlined_call_operand.vmem [shape: bf16[64,32], index: 3, kind: input, shape index: {}]   ;;  %s1203_s4 = inlined_call_operand.vmem [shape: f32[1,32], index: 4, kind: input, shape index: {}]   ;;  %s1204_s5 = inlined_call_operand.vmem [shape: bf16[32,128], index: 5, kind: input, shape index: {}]   ;;  %s1205_s6 = inlined_call_operand.vmem [shape: f32[1,128], index: 6, kind: input, shape index: {}]   ;;  %s1206_s7 = inlined_call_operand.vmem [shape: bf16[48,128], index: 7, kind: output, shape index: {}]  }
   0x1 LB: > { %s809_s25 = sadd.s32 4294967295, %s969_s24   ;;  %p813_p0 = scmp.ge.s32.totalorder %s969_s24, 1  ;;  %s969_s24 = sphi %s1021_s24, %s17_s24  }
   0x2   : > { %p238_p1 = scmp.lt.s32.totalorder %s969_s24, 4 }
   0x4   : > { %p239_p2 = pnand %p813_p0, %p238_p1 }
   0x5   : > { %s814_s26 = sshll.u32 (!%p239_p2), %s809_s25, 1  ;;  %v285_v0 = vlaneseq (!%p239_p2)  ;;  %v971_v1 = vmov (!%p239_p2), 1   ;;  %v972_v2 = vmov (!%p239_p2), 0   ;;  %v973_v9 = vmov (!%p239_p2), 2   ;;  %v941_v11 = vld [vmem:[%s1200_s1 + $0x40] sm:$0xff] (!%p239_p2)   ;;  %v943_v15 = vld [vmem:[%s1200_s1 + $0x48] sm:$0xff] (!%p239_p2)  }
   0x6   : > { %242 = sbr.rel (%p239_p2) target bundleno = 858 (0x35a), region = 48  ;;  %929 = vset.pattern.permute.xlu1 (!%p239_p2), %v971_v1  ;;  %928 = vset.pattern.permute.xlu0 (!%p239_p2), %v972_v2  ;;  %p271_p3 = scmp.lt.s32.totalorder (!%p239_p2), %s814_s26, 5  ;;  %v974_v10 = vmov (!%p239_p2), 3   ;;  %v975_v12 = vmov (!%p239_p2), 4   ;;  %v976_v13 = vmov (!%p239_p2), 5   ;;  %v942_v14 = vld [vmem:[%s1200_s1] sm:$0xff] (!%p239_p2)  }
   0x7   : > { %v1029_v3 = vand.u32 (!%p239_p2), 127, %v285_v0  ;;  %860 = vmatprep.subr.bf16.mxu0 (!%p239_p2), %v941_v11  ;;  %v944_v16 = vld [vmem:[%s1200_s1 + $0x8] sm:$0xff] (!%p239_p2)   ;;  %v977_v17 = vmov (!%p239_p2), 6   ;;  %v945_v18 = vld [vmem:[%s1200_s1 + $0x50] sm:$0xff] (!%p239_p2)   ;;  %v947_v20 = vld [vmem:[%s1200_s1 + $0x58] sm:$0xff] (!%p239_p2)   ;;  %v978_v21 = vmov (!%p239_p2), 7  }
   0x8   : > { %861 = vmatpush3.bf16.msra.mxu0 (!%p239_p2), %v942_v14  ;;  %v946_v19 = vld [vmem:[%s1200_s1 + $0x10] sm:$0xff] (!%p239_p2)   ;;  %v948_v22 = vld [vmem:[%s1200_s1 + $0x18] sm:$0xff] (!%p239_p2)   ;;  %v949_v23 = vld [vmem:[%s1200_s1 + $0x60] sm:$0xff] (!%p239_p2)   ;;  %v979_v26 = vmov (!%p239_p2), 0.0   ;;  %v1213_v46 = vmov (!%p239_p2), 0  ;;  %v1216_v50 = vmov (!%p239_p2), 0 }
   0x9   : > { %v287_v4 = vmul.u32 (!%p239_p2), 32, %v1029_v3  ;;  %862 = vmatprep.subr.bf16.mxu0 (!%p239_p2), %v943_v15  ;;  %v950_v24 = vld [vmem:[%s1200_s1 + $0x20] sm:$0xff] (!%p239_p2)   ;;  %v951_v25 = vld [vmem:[%s1200_s1 + $0x68] sm:$0xff] (!%p239_p2)   ;;  %890 = vmatprep.subr.bf16.mxu1 (!%p239_p2), %v979_v26  ;;  %v953_v28 = vld [vmem:[%s1200_s1 + $0x70] sm:$0xff] (!%p239_p2)   ;;  %v1092_v38 = vadd.s32 (!%p239_p2), 128, %v1029_v3 }
   0xa   : > { %v952_v27 = vld [vmem:[%s1200_s1 + $0x28] sm:$0xff] (!%p239_p2)   ;;  %v954_v29 = vld [vmem:[%s1200_s1 + $0x30] sm:$0xff] (!%p239_p2)   ;;  %v955_v30 = vld [vmem:[%s1200_s1 + $0x78] sm:$0xff] (!%p239_p2)  }
   0xb   : > { %v956_v31 = vld [vmem:[%s1200_s1 + $0x38] sm:$0xff] (!%p239_p2)   ;;  %v957_v32 = vld [vmem:[%s1202_s3] sm:$0xff] (!%p239_p2)   ;;  %v958_v61 = vld [vmem:[%s1202_s3 + $0x8] sm:$0xff] (!%p239_p2)  }
   0xc   : > { %863 = vmatpush3.bf16.msra.mxu0 (!%p239_p2), %v944_v16  ;;  %891 = vmatpush3.bf16.msra.mxu1 (!%p239_p2), %v957_v32  ;;  %v959_v62 = vld [vmem:[%s1202_s3 + $0x10] sm:$0xff] (!%p239_p2)   ;;  %v960_v63 = vld [vmem:[%s1202_s3 + $0x18] sm:$0xff] (!%p239_p2)   ;;  %v822_v1 = vld [vmem:[%s1201_s2] ss:$0 sm:$0xff] (!%p239_p2) }
   0xd   : > { %s1220_s26 = smov (!%p271_p3, %s814_s26), 5  ;;  %864 = vmatprep.subr.bf16.mxu0 %v945_v18  ;;  %892 = vmatprep.subr.bf16.mxu1 %v979_v26  ;;  %v839_v14 = vld [vmem:[%s1203_s4] ss:$0 sm:$0xff] }
   0xe   : > { %s815_s27 = sshll.u32 %s1220_s26, 3  ;;  %s817_s16 = sshll.u32 %s1220_s26, 2 }
   0xf   : > { %s274_s30 = scalar_lea.vmem %s1199_s0, %s815_s27  ;;  %s280_s19 = scalar_lea.vmem %s1206_s7, %s817_s16 }
  0x10   : > { %v283_v5 = vld [vmem:[%s274_s30] sm:$0xff]  ;;  %v284_v6 = vld [vmem:[%s274_s30 + $0x8] sm:$0xff]  ;;  %865 = vmatpush3.bf16.msra.mxu0 %v946_v19  ;;  %893 = vmatpush3.bf16.msra.mxu1 %v958_v61 }
  0x11   : > { %v288_v7 = vadd.s32 %v287_v4, %v283_v5  ;;  %v289_v8 = vadd.s32 %v287_v4, %v284_v6  ;;  %866 = vmatprep.subr.bf16.mxu0 %v947_v20  ;;  %894 = vmatprep.subr.bf16.mxu1 %v979_v26 }
  0x13   : > { %302 = vperm.xlu1 %929, %v288_v7   ;;  %292 = vperm.xlu0 %928, %v288_v7  }
  0x14   : > { %867 = vmatpush3.bf16.msra.mxu0 %v948_v22  ;;  %895 = vmatpush3.bf16.msra.mxu1 %v959_v62 }
  0x15   : > { %868 = vmatprep.subr.bf16.mxu0 %v949_v23  ;;  %896 = vmatprep.subr.bf16.mxu1 %v979_v26 }
  0x17   : > { %305 = vperm.xlu1 %929, %v289_v8   ;;  %295 = vperm.xlu0 %928, %v289_v8  }
  0x18   : > { %869 = vmatpush3.bf16.msra.mxu0 %v950_v24  ;;  %897 = vmatpush3.bf16.msra.mxu1 %v960_v63  ;;  %v845_v24 = vld [vmem:[%s1205_s6] ss:$0 sm:$0xff] }
  0x19   : > { %870 = vmatprep.subr.bf16.mxu0 %v951_v25  ;;  %902 = vmatprep.subr.bf16.mxu1 %v979_v26 }
  0x1b   : > { %931 = vset.pattern.permute.xlu1 %v973_v9  ;;  %930 = vset.pattern.permute.xlu0 %v973_v9 }
  0x1c   : > { %319 = vperm.xlu1 %931, %v289_v8   ;;  %316 = vperm.xlu0 %930, %v288_v7  }
  0x1d   : > { %871 = vmatpush3.bf16.msra.mxu0 %v952_v27 }
  0x1e   : > { %872 = vmatprep.subr.bf16.mxu0 %v953_v28 }
  0x20   : > { %932 = vset.pattern.permute.xlu1 %v974_v10  ;;  %933 = vset.pattern.permute.xlu0 %v974_v10 }
  0x21   : > { %330 = vperm.xlu1 %932, %v288_v7   ;;  %333 = vperm.xlu0 %933, %v289_v8  }
  0x22   : > { %873 = vmatpush3.bf16.msra.mxu0 %v954_v29 }
  0x23   : > { %874 = vmatprep.subr.bf16.mxu0 %v955_v30 }
  0x25   : > { %934 = vset.pattern.permute.xlu1 %v975_v12  ;;  %935 = vset.pattern.permute.xlu0 %v976_v13  ;;  %v961_v12 = vld [vmem:[%s1204_s5] sm:$0xff]  }
  0x26   : > { %344 = vperm.xlu1 %934, %v288_v7   ;;  %358 = vperm.xlu0 %935, %v288_v7  }
  0x27   : > { %875 = vmatpush3.bf16.msra.mxu0 %v956_v31 }
  0x2a   : > { %347 = vperm.xlu1 %934, %v289_v8   ;;  %938 = vset.pattern.permute.xlu0 %v977_v17 }
  0x2b   : > { %375 = vperm.xlu0 %938, %v289_v8  }
  0x2e   : > { %936 = vset.pattern.permute.xlu1 %v976_v13  ;;  %v962_v13 = vld [vmem:[%s1204_s5 + $0x8] sm:$0xff]  }
  0x2f   : > { %361 = vperm.xlu1 %936, %v289_v8   ;;  %940 = vset.pattern.permute.xlu0 %v978_v21 }
  0x33   : > { %937 = vset.pattern.permute.xlu1 %v977_v17 }
  0x34   : > { %372 = vperm.xlu1 %937, %v288_v7  }
  0x38   : > { %939 = vset.pattern.permute.xlu1 %v978_v21 }
  0x39   : > { %386 = vperm.xlu1 %939, %v288_v7  }
  0x3d   : > { %389 = vperm.xlu1 %939, %v289_v8  }
  0x92   : > { %v303_v33 = vpop.permute.xlu1 %302  ;;  %v293_v34 = vpop.permute.xlu0 %292 }
  0x93   : > { %vm307_vm0 = vcmp.eq.s32.totalorder %v303_v33, %v1029_v3  ;;  %vm297_vm1 = vcmp.eq.s32.totalorder %v293_v34, %v1029_v3  ;;  %vm308_vm2 = vcmp.eq.s32.totalorder %v303_v33, %v1092_v38  ;;  %vm298_vm3 = vcmp.eq.s32.totalorder %v293_v34, %v1092_v38 }
  0x94   : > { %vm1100_vm6 = vmor %vm297_vm1, %vm307_vm0 }
  0x95   : > { %vm1106_vm9 = vmor %vm298_vm3, %vm308_vm2 }
  0x96   : > { %v306_v35 = vpop.permute.xlu1 %305  ;;  %v296_v37 = vpop.permute.xlu0 %295 }
  0x97   : > { %vm309_vm4 = vcmp.eq.s32.totalorder %v306_v35, %v1029_v3  ;;  %vm299_vm5 = vcmp.eq.s32.totalorder %v296_v37, %v1029_v3  ;;  %vm310_vm7 = vcmp.eq.s32.totalorder %v306_v35, %v1092_v38  ;;  %vm300_vm8 = vcmp.eq.s32.totalorder %v296_v37, %v1092_v38 }
  0x98   : > { %vm313_vm11 = vmor %vm299_vm5, %vm309_vm4 }
  0x99   : > { %vm314_vm13 = vmor %vm300_vm8, %vm310_vm7 }
  0x9b   : > { %v320_v36 = vpop.permute.xlu1 %319  ;;  %v317_v40 = vpop.permute.xlu0 %316 }
  0x9c   : > { %vm323_vm10 = vcmp.eq.s32.totalorder %v320_v36, %v1029_v3  ;;  %vm324_vm12 = vcmp.eq.s32.totalorder %v320_v36, %v1092_v38  ;;  %vm321_vm14 = vcmp.eq.s32.totalorder %v317_v40, %v1029_v3  ;;  %vm322_vm0 = vcmp.eq.s32.totalorder %v317_v40, %v1092_v38 }
  0x9d   : > { %vm1113_vm15 = vmor %vm313_vm11, %vm323_vm10 }
  0x9e   : > { %vm1118_vm1 = vmor %vm314_vm13, %vm324_vm12 }
  0x9f   : > { %v1214_v46 = vsel %vm1118_vm1, 4294967295, %v1213_v46  ;;  %vm325_vm3 = vmor %vm1100_vm6, %vm321_vm14 }
  0xa0   : > { %v331_v39 = vpop.permute.xlu1 %330  ;;  %v334_v45 = vpop.permute.xlu0 %333  ;;  %vm326_vm5 = vmor %vm1106_vm9, %vm322_vm0  ;;  %vm1215_vm9 = vnez %v1214_v46 }
  0xa1   : > { %vm335_vm2 = vcmp.eq.s32.totalorder %v331_v39, %v1029_v3  ;;  %vm336_vm4 = vcmp.eq.s32.totalorder %v331_v39, %v1092_v38  ;;  %vm337_vm7 = vcmp.eq.s32.totalorder %v334_v45, %v1029_v3  ;;  %vm338_vm12 = vcmp.eq.s32.totalorder %v334_v45, %v1092_v38 }
  0xa2   : > { %vm339_vm8 = vmor %vm325_vm3, %vm335_vm2 }
  0xa3   : > { %vm340_vm11 = vmor %vm326_vm5, %vm336_vm4 }
  0xa4   : > { %vm341_vm13 = vmor %vm1113_vm15, %vm337_vm7 }
  0xa5   : > { %v345_v43 = vpop.permute.xlu1 %344  ;;  %v359_v48 = vpop.permute.xlu0 %358  ;;  %vm342_vm0 = vmor %vm1215_vm9, %vm338_vm12 }
  0xa6   : > { %vm349_vm10 = vcmp.eq.s32.totalorder %v345_v43, %v1029_v3  ;;  %vm350_vm1 = vcmp.eq.s32.totalorder %v345_v43, %v1092_v38  ;;  %vm363_vm14 = vcmp.eq.s32.totalorder %v359_v48, %v1029_v3 }
  0xa7   : > { %vm353_vm6 = vmor %vm339_vm8, %vm349_vm10  ;;  %vm364_vm10 = vcmp.eq.s32.totalorder %v359_v48, %v1092_v38 }
  0xa8   : > { %vm354_vm3 = vmor %vm340_vm11, %vm350_vm1 }
  0xa9   : > { %v348_v47 = vpop.permute.xlu1 %347  ;;  %vm1139_vm5 = vmor %vm353_vm6, %vm363_vm14 }
  0xaa   : > { %vm351_vm2 = vcmp.eq.s32.totalorder %v348_v47, %v1029_v3  ;;  %vm352_vm4 = vcmp.eq.s32.totalorder %v348_v47, %v1092_v38  ;;  %v1217_v50 = vsel %vm1139_vm5, 4294967295, %v1216_v50  ;;  %v376_v51 = vpop.permute.xlu0 %375  ;;  %vm368_vm14 = vmor %vm354_vm3, %vm364_vm10 }
  0xab   : > { %vm355_vm7 = vmor %vm341_vm13, %vm351_vm2  ;;  %vm379_vm1 = vcmp.eq.s32.totalorder %v376_v51, %v1029_v3  ;;  %vm380_vm6 = vcmp.eq.s32.totalorder %v376_v51, %v1092_v38 }
  0xac   : > { %vm356_vm9 = vmor %vm342_vm0, %vm352_vm4 }
  0xae   : > { %v362_v49 = vpop.permute.xlu1 %361 }
  0xaf   : > { %vm365_vm15 = vcmp.eq.s32.totalorder %v362_v49, %v1029_v3  ;;  %vm366_vm8 = vcmp.eq.s32.totalorder %v362_v49, %v1092_v38 }
  0xb0   : > { %vm369_vm12 = vmor %vm355_vm7, %vm365_vm15  ;;  %vm1218_vm7 = vnez %v1217_v50 }
  0xb1   : > { %vm370_vm11 = vmor %vm356_vm9, %vm366_vm8 }
  0xb2   : > { %vm383_vm2 = vmor %vm369_vm12, %vm379_vm1 }
  0xb3   : > { %v373_v52 = vpop.permute.xlu1 %372  ;;  %vm384_vm0 = vmor %vm370_vm11, %vm380_vm6 }
  0xb4   : > { %vm377_vm5 = vcmp.eq.s32.totalorder %v373_v52, %v1029_v3  ;;  %vm378_vm13 = vcmp.eq.s32.totalorder %v373_v52, %v1092_v38 }
  0xb5   : > { %vm381_vm15 = vmor %vm1218_vm7, %vm377_vm5  ;;  %vm980_vm5 = vmmov 0  }
  0xb6   : > { %vm382_vm9 = vmor %vm368_vm14, %vm378_vm13  ;;  %898 = vmatprep.mubr.msk.bf16.mxu1 %vm980_vm5, %v979_v26  ;;  %vm627_vm14 = vcmask 523264  }
  0xb8   : > { %v387_v53 = vpop.permute.xlu1 %386 }
  0xb9   : > { %vm391_vm4 = vcmp.eq.s32.totalorder %v387_v53, %v1029_v3  ;;  %vm392_vm8 = vcmp.eq.s32.totalorder %v387_v53, %v1092_v38 }
  0xba   : > { %vm395_vm3 = vmor %vm381_vm15, %vm391_vm4 }
  0xbb   : > { %vm396_vm12 = vmor %vm382_vm9, %vm392_vm8  ;;  %v818_v55 = vsel %vm395_vm3, 1.0, %v979_v26 }
  0xbc   : > { %v390_v54 = vpop.permute.xlu1 %389  ;;  %v819_v58 = vsel %vm396_vm12, 1.0, %v979_v26 }
  0xbd   : > { %vm393_vm10 = vcmp.eq.s32.totalorder %v390_v54, %v1029_v3  ;;  %vm394_vm1 = vcmp.eq.s32.totalorder %v390_v54, %v1092_v38 }
  0xbe   : > { %vm397_vm6 = vmor %vm383_vm2, %vm393_vm10  ;;  %vm698_vm2 = vcmask 261120  }
  0xbf   : > { %vm398_vm11 = vmor %vm384_vm0, %vm394_vm1  ;;  %v820_v56 = vsel %vm397_vm6, 1.0, %v979_v26 }
  0xc0   : > { %v407_v57 = vpack.c.bf16 %v820_v56, %v818_v55  ;;  %v821_v59 = vsel %vm398_vm11, 1.0, %v979_v26 }
  0xc1   : > { %v408_v60 = vpack.c.bf16 %v821_v59, %v819_v58 }
  0xc3   : > { %576 = vmatprep.mubr.bf16.mxu0 %v408_v60 }
  0xc4   : > { %577 = vmatmul.mubr.bf16.vlgmr.msra.gmra.mrb[0].mxu0 %v407_v57 }
 0x197   : > { %v876_v0 = vpop.f32.mrb[0].mxu0 }
 0x198   : > { %v877_v2 = vpop.f32.mrb[1].mxu0 }
 0x199   : > { %v878_v3 = vadd.f32 %v877_v2, %v876_v0  ;;  %v879_v4 = vpop.f32.mrb[2].mxu0 }
 0x19a   : > { %v880_v5 = vpop.f32.mrb[3].mxu0 }
 0x19b   : > { %v579_v6 = vadd.f32 %v878_v3, %v822_v1  ;;  %v881_v7 = vadd.f32 %v880_v5, %v879_v4 }
 0x19d   : > { %v582_v8 = vadd.f32 %v881_v7, %v822_v1  ;;  %v585_v9 = vmax.f32 %v579_v6, 0.0 }
 0x19f   : > { %v586_v10 = vmax.f32 %v582_v8, 0.0 }
 0x1a1   : > { %v587_v11 = vpack.c.bf16 %v586_v10, %v585_v9 }
 0x1a3   : > { %899 = vmatmul.mubr.msk.bf16.vlgmr.msra.gmra.mrb[0].mxu1 %vm627_vm14, %v587_v11 }
 0x1a4   : > { %906 = vmatprep.mubr.msk.bf16.mxu1 %vm980_vm5, %v979_v26  ;;  %903 = vmatpush3.bf16.msra.mxu1 %v961_v12 }
 0x1a5   : > { %904 = vmatprep.subr.bf16.mxu1 %v979_v26 }
 0x1a8   : > { %905 = vmatpush3.bf16.msra.mxu1 %v962_v13 }
 0x276   : > { %v665_v15 = vpop.f32.mrb[0].mxu1 }
 0x277   : > { %v666_v16 = vadd.f32 %v839_v14, %v665_v15  ;;  %v900_v17 = vpop.f32.mrb[1].mxu1 }
 0x278   : > { %v668_v18 = vpop.f32.mrb[2].mxu1 }
 0x279   : > { %v669_v19 = vadd.f32 %v839_v14, %v668_v18  ;;  %v901_v20 = vpop.f32.mrb[3].mxu1  ;;  %v672_v21 = vmax.f32 %v666_v16, 0.0 }
 0x27b   : > { %v673_v22 = vmax.f32 %v669_v19, 0.0 }
 0x27d   : > { %v674_v23 = vpack.c.bf16 %v673_v22, %v672_v21 }
 0x27f   : > { %907 = vmatmul.mubr.msk.bf16.vlgmr.msra.gmra.mrb[4].mxu1 %vm698_vm2, %v674_v23 }
 0x352   : > { %v736_v25 = vpop.f32.mrb[4].mxu1 }
 0x353   : > { %v908_v26 = vpop.f32.mrb[5].mxu1  ;;  %v737_v28 = vadd.f32 %v845_v24, %v736_v25 }
 0x354   : > { %v739_v27 = vpop.f32.mrb[6].mxu1 }
 0x355   : > { %v740_v29 = vadd.f32 %v845_v24, %v739_v27  ;;  %v909_v30 = vpop.f32.mrb[7].mxu1 }
 0x357   : > { %v858_v31 = vpack.c.bf16 %v740_v29, %v737_v28 }
 0x359   : > { %859 = vst [vmem:[%s280_s19] sm:$0xff] %v858_v31  }
 0x35a PF: > { %s17_s24 = sadd.s32 1, %s969_s24  }
 0x35b   : > { %p14_p4 = scmp.ge.s32.totalorder %s17_s24, 5  }
 0x35d   :  { %16 = sbr.rel (!%p14_p4) target bundleno = 1 (0x1), region = 78 }

</bundles_post_ra>
